<compile_context>
chip_gen: v5e
topology: v5e:2x2
jax: 0.10.0
libtpu: 0.0.40
codegen_flags: <defaults>
</compile_context>

<pallas_src>
import jax
import jax.numpy as jnp
from jax.experimental import pallas as pl
from jax.experimental.pallas import tpu as pltpu

# ---- model hyper-parameters (from the PyTorch module) ----
HIDDEN_SIZE = 8
NUM_LAYERS = 2
SEQ_LEN = 5
INPUT_SIZE = 4   # input_size = x_seq.size(2); small & consistent
BATCH = 2
SUBLANES = 8     # pad batch up to this many rows


def lstm_kernel(x_ref,          # (T*Bp, D)   time-major, row block t = timestep t
                wih0_ref,       # (D, 4H)     columns ordered [i|f|o|g]
                whh0_ref,       # (H, 4H)
                b0_ref,         # (1, 4H)     b_ih + b_hh, layer 0
                w1_ref,         # (2H, 4H)    [Wih1; Whh1] stacked, fused layer-1 matmul
                b1_ref,         # (1, 4H)     b_ih + b_hh, layer 1
                wfc_ref,        # (T, H)      row t = fc weights for timestep t's hidden
                bfc_ref,        # (1, 1)
                out_ref):       # (Bp, 1)
    T, H = wfc_ref.shape
    Bp = out_ref.shape[0]

    whh0 = whh0_ref[...]
    w1 = w1_ref[...]
    wfc = wfc_ref[...]

    # Off the serial chain: every timestep's layer-0 input projection in one MXU matmul,
    # with the layer-0 bias folded in.
    x_proj = (jnp.dot(x_ref[...], wih0_ref[...], preferred_element_type=jnp.float32)
              + b0_ref[...])                               # (T*Bp, 4H)

    # Hoist the layer-1 bias broadcast (JAX does not CSE broadcast_in_dim inside the loop).
    b1_b = jnp.broadcast_to(b1_ref[...], (Bp, 4 * H))

    def activate(gates):
        # gates laid out [i | f | o | g]: one sigmoid over 3H lanes, one tanh over H lanes.
        sg = jax.nn.sigmoid(gates[:, :3 * H])
        g_g = jnp.tanh(gates[:, 3 * H:])
        i_g = sg[:, 0 * H:1 * H]
        f_g = sg[:, 1 * H:2 * H]
        o_g = sg[:, 2 * H:3 * H]
        return i_g, f_g, o_g, g_g

    h0 = jnp.zeros((Bp, H), jnp.float32)
    c0 = jnp.zeros((Bp, H), jnp.float32)
    h1 = jnp.zeros((Bp, H), jnp.float32)
    c1 = jnp.zeros((Bp, H), jnp.float32)
    fc_acc = jnp.zeros((Bp, H), jnp.float32)

    for t in range(T):                                     # T small & static: unrolled
        # ---- layer 0: only the recurrent matmul is on the dependency chain ----
        g0 = (x_proj[t * Bp:(t + 1) * Bp, :]
              + jnp.dot(h0, whh0, preferred_element_type=jnp.float32))
        i_g, f_g, o_g, g_g = activate(g0)
        c0 = f_g * c0 + i_g * g_g
        h0 = o_g * jnp.tanh(c0)

        # ---- layer 1: single fused matmul per step ----
        hcat = jnp.concatenate([h0, h1], axis=-1)          # (Bp, 2H)
        g1 = jnp.dot(hcat, w1, preferred_element_type=jnp.float32) + b1_b
        i_g, f_g, o_g, g_g = activate(g1)
        c1 = f_g * c1 + i_g * g_g
        h1 = o_g * jnp.tanh(c1)

        # ---- FC contribution: VPU multiply, reduced once after the loop ----
        fc_acc = fc_acc + h1 * wfc[t:t + 1, :]

    logits = jnp.sum(fc_acc, axis=-1, keepdims=True) + bfc_ref[...]   # (Bp, 1)
    out_ref[...] = jax.nn.sigmoid(logits)


def lstm_forward(x, params):
    """x: (B, T, D) float32, batch_first like the PyTorch module. Returns (B, 1)."""
    B, T, D = x.shape
    H = HIDDEN_SIZE

    # Permute PyTorch gate order [i|f|g|o] -> [i|f|o|g] (one sigmoid + one tanh in-kernel).
    perm = jnp.concatenate([jnp.arange(0, H), jnp.arange(H, 2 * H),
                            jnp.arange(3 * H, 4 * H), jnp.arange(2 * H, 3 * H)])

    wih0_t = params["w_ih_l0"][perm, :].T                       # (D, 4H)
    whh0_t = params["w_hh_l0"][perm, :].T                       # (H, 4H)
    b0 = (params["b_ih_l0"] + params["b_hh_l0"])[perm].reshape(1, 4 * H)
    w1 = jnp.concatenate([params["w_ih_l1"][perm, :].T,         # (2H, 4H) fused layer-1 weight
                          params["w_hh_l1"][perm, :].T], axis=0)
    b1 = (params["b_ih_l1"] + params["b_hh_l1"])[perm].reshape(1, 4 * H)
    wfc_th = params["w_fc"].reshape(T, H)                       # row t = weights for h1[t]
    bfc = params["b_fc"].reshape(1, 1)

    # Pad batch up to the sublane count: same vreg/MXU cost, denser tiles.
    Bp = max(SUBLANES, ((B + SUBLANES - 1) // SUBLANES) * SUBLANES)
    x_pad = jnp.zeros((Bp, T, D), jnp.float32).at[:B].set(x)
    x2d = jnp.transpose(x_pad, (1, 0, 2)).reshape(T * Bp, D)    # time-major slab

    vmem = pl.BlockSpec(memory_space=pltpu.MemorySpace.VMEM)
    out_pad = pl.pallas_call(
        lstm_kernel,
        out_shape=jax.ShapeDtypeStruct((Bp, 1), jnp.float32),
        in_specs=[vmem] * 8,
        out_specs=vmem,
    )(x2d, wih0_t, whh0_t, b0, w1, b1, wfc_th, bfc)
    return out_pad[:B]


def make_params(key):
    """Deterministic PyTorch-style uniform(-1/sqrt(H), 1/sqrt(H)) init."""
    H, D, T = HIDDEN_SIZE, INPUT_SIZE, SEQ_LEN
    bound = 1.0 / jnp.sqrt(jnp.float32(H))
    shapes = {
        "w_ih_l0": (4 * H, D),
        "w_hh_l0": (4 * H, H),
        "b_ih_l0": (4 * H,),
        "b_hh_l0": (4 * H,),
        "w_ih_l1": (4 * H, H),
        "w_hh_l1": (4 * H, H),
        "b_ih_l1": (4 * H,),
        "b_hh_l1": (4 * H,),
        "w_fc": (1, H * T),
        "b_fc": (1,),
    }
    params = {}
    for name, shape in shapes.items():
        key, sub = jax.random.split(key)
        params[name] = jax.random.uniform(sub, shape, jnp.float32, -bound, bound)
    return params


def reference_forward(x, params):
    """Pure-JAX reference matching nn.LSTM(num_layers=2, batch_first=True) + fc + sigmoid."""
    B, T, D = x.shape
    H = HIDDEN_SIZE

    def cell(x_t, h, c, w_ih, w_hh, b_ih, b_hh):
        gates = x_t @ w_ih.T + h @ w_hh.T + b_ih + b_hh
        i_g = jax.nn.sigmoid(gates[:, 0 * H:1 * H])
        f_g = jax.nn.sigmoid(gates[:, 1 * H:2 * H])
        g_g = jnp.tanh(gates[:, 2 * H:3 * H])
        o_g = jax.nn.sigmoid(gates[:, 3 * H:4 * H])
        c_new = f_g * c + i_g * g_g
        return o_g * jnp.tanh(c_new), c_new

    h0 = c0 = jnp.zeros((B, H), jnp.float32)
    h1 = c1 = jnp.zeros((B, H), jnp.float32)
    outs = []
    for t in range(T):
        h0, c0 = cell(x[:, t, :], h0, c0,
                      params["w_ih_l0"], params["w_hh_l0"],
                      params["b_ih_l0"], params["b_hh_l0"])
        h1, c1 = cell(h0, h1, c1,
                      params["w_ih_l1"], params["w_hh_l1"],
                      params["b_ih_l1"], params["b_hh_l1"])
        outs.append(h1)
    feats = jnp.concatenate(outs, axis=-1)                 # (B, T*H) == out.reshape(B, -1)
    logits = feats @ params["w_fc"].T + params["b_fc"]
    return jax.nn.sigmoid(logits)


if __name__ == "__main__":
    key = jax.random.PRNGKey(0)
    key, kx = jax.random.split(key)
    x = jax.random.normal(kx, (BATCH, SEQ_LEN, INPUT_SIZE), jnp.float32)
    params = make_params(key)

    out = lstm_forward(x, params)
    out = jax.block_until_ready(out)

    ref = reference_forward(x, params)
    assert out.shape == (BATCH, 1)
    assert jnp.allclose(out, ref, atol=1e-5, rtol=1e-5), (out, ref)
    print("KERNEL_OK")
</pallas_src>

<mosaic_0001>
module attributes {stable_mosaic.version = 11 : i64} {
  func.func @lstm_kernel(%arg0: memref<40x4xf32, #tpu.memory_space<vmem>>, %arg1: memref<4x32xf32, #tpu.memory_space<vmem>>, %arg2: memref<8x32xf32, #tpu.memory_space<vmem>>, %arg3: memref<1x32xf32, #tpu.memory_space<vmem>>, %arg4: memref<16x32xf32, #tpu.memory_space<vmem>>, %arg5: memref<1x32xf32, #tpu.memory_space<vmem>>, %arg6: memref<5x8xf32, #tpu.memory_space<vmem>>, %arg7: memref<1x1xf32, #tpu.memory_space<vmem>>, %arg8: memref<8x1xf32, #tpu.memory_space<vmem>>) attributes {dimension_semantics = [], scalar_prefetch = 0 : i64, scratch_operands = 0 : i64, tpu.core_type = #tpu.core_type<tc>} {
    %c0 = arith.constant 0 : index
    %c0_0 = arith.constant 0 : index
    %0 = vector.load %arg2[%c0, %c0_0] : memref<8x32xf32, #tpu.memory_space<vmem>>, vector<8x32xf32>
    %c0_1 = arith.constant 0 : index
    %c0_2 = arith.constant 0 : index
    %1 = vector.load %arg4[%c0_1, %c0_2] : memref<16x32xf32, #tpu.memory_space<vmem>>, vector<16x32xf32>
    %c0_3 = arith.constant 0 : index
    %c0_4 = arith.constant 0 : index
    %2 = vector.load %arg6[%c0_3, %c0_4] : memref<5x8xf32, #tpu.memory_space<vmem>>, vector<5x8xf32>
    %c0_5 = arith.constant 0 : index
    %c0_6 = arith.constant 0 : index
    %3 = vector.load %arg0[%c0_5, %c0_6] : memref<40x4xf32, #tpu.memory_space<vmem>>, vector<40x4xf32>
    %c0_7 = arith.constant 0 : index
    %c0_8 = arith.constant 0 : index
    %4 = vector.load %arg1[%c0_7, %c0_8] : memref<4x32xf32, #tpu.memory_space<vmem>>, vector<4x32xf32>
    %cst = arith.constant dense<0.000000e+00> : vector<40x32xf32>
    %5 = tpu.matmul %3, %4, %cst {dimension_numbers = #tpu.dot_dimension_numbers<[1], [0], [0], [1], [0, 0, 1, 1], [], []>} : vector<40x4xf32>, vector<4x32xf32>, vector<40x32xf32> -> vector<40x32xf32>
    %c0_9 = arith.constant 0 : index
    %c0_10 = arith.constant 0 : index
    %6 = vector.load %arg3[%c0_9, %c0_10] : memref<1x32xf32, #tpu.memory_space<vmem>>, vector<1x32xf32>
    %7 = vector.broadcast %6 : vector<1x32xf32> to vector<40x32xf32>
    %8 = arith.addf %5, %7 : vector<40x32xf32>
    %c0_11 = arith.constant 0 : index
    %c0_12 = arith.constant 0 : index
    %9 = vector.load %arg5[%c0_11, %c0_12] : memref<1x32xf32, #tpu.memory_space<vmem>>, vector<1x32xf32>
    %10 = vector.shape_cast %9 : vector<1x32xf32> to vector<1x32xf32>
    %11 = vector.broadcast %10 : vector<1x32xf32> to vector<8x32xf32>
    %cst_13 = arith.constant 0.000000e+00 : f32
    %12 = vector.broadcast %cst_13 : f32 to vector<8x8xf32>
    %cst_14 = arith.constant 0.000000e+00 : f32
    %13 = vector.broadcast %cst_14 : f32 to vector<8x8xf32>
    %cst_15 = arith.constant 0.000000e+00 : f32
    %14 = vector.broadcast %cst_15 : f32 to vector<8x8xf32>
    %cst_16 = arith.constant 0.000000e+00 : f32
    %15 = vector.broadcast %cst_16 : f32 to vector<8x8xf32>
    %cst_17 = arith.constant 0.000000e+00 : f32
    %16 = vector.broadcast %cst_17 : f32 to vector<8x8xf32>
    %17 = vector.extract_strided_slice %8 {offsets = [0, 0], sizes = [8, 32], strides = [1, 1]} : vector<40x32xf32> to vector<8x32xf32>
    %cst_18 = arith.constant dense<0.000000e+00> : vector<8x32xf32>
    %18 = tpu.matmul %12, %0, %cst_18 {dimension_numbers = #tpu.dot_dimension_numbers<[1], [0], [0], [1], [0, 0, 1, 1], [], []>} : vector<8x8xf32>, vector<8x32xf32>, vector<8x32xf32> -> vector<8x32xf32>
    %19 = arith.addf %17, %18 : vector<8x32xf32>
    %20 = vector.extract_strided_slice %19 {offsets = [0, 0], sizes = [8, 24], strides = [1, 1]} : vector<8x32xf32> to vector<8x24xf32>
    %21 = arith.negf %20 : vector<8x24xf32>
    %22 = math.exp %21 : vector<8x24xf32>
    %cst_19 = arith.constant 1.000000e+00 : f32
    %23 = vector.broadcast %cst_19 : f32 to vector<8x24xf32>
    %24 = arith.addf %23, %22 : vector<8x24xf32>
    %25 = arith.divf %23, %24 : vector<8x24xf32>
    %26 = vector.extract_strided_slice %19 {offsets = [0, 24], sizes = [8, 8], strides = [1, 1]} : vector<8x32xf32> to vector<8x8xf32>
    %27 = math.tanh %26 : vector<8x8xf32>
    %28 = vector.extract_strided_slice %25 {offsets = [0, 0], sizes = [8, 8], strides = [1, 1]} : vector<8x24xf32> to vector<8x8xf32>
    %29 = vector.extract_strided_slice %25 {offsets = [0, 8], sizes = [8, 8], strides = [1, 1]} : vector<8x24xf32> to vector<8x8xf32>
    %30 = vector.extract_strided_slice %25 {offsets = [0, 16], sizes = [8, 8], strides = [1, 1]} : vector<8x24xf32> to vector<8x8xf32>
    %31 = arith.mulf %29, %13 : vector<8x8xf32>
    %32 = arith.mulf %28, %27 : vector<8x8xf32>
    %33 = arith.addf %31, %32 : vector<8x8xf32>
    %34 = math.tanh %33 : vector<8x8xf32>
    %35 = arith.mulf %30, %34 : vector<8x8xf32>
    %36 = tpu.concatenate %35, %14 in 1 : vector<8x8xf32>, vector<8x8xf32> -> vector<8x16xf32>
    %cst_20 = arith.constant dense<0.000000e+00> : vector<8x32xf32>
    %37 = tpu.matmul %36, %1, %cst_20 {dimension_numbers = #tpu.dot_dimension_numbers<[1], [0], [0], [1], [0, 0, 1, 1], [], []>} : vector<8x16xf32>, vector<16x32xf32>, vector<8x32xf32> -> vector<8x32xf32>
    %38 = arith.addf %37, %11 : vector<8x32xf32>
    %39 = vector.extract_strided_slice %38 {offsets = [0, 0], sizes = [8, 24], strides = [1, 1]} : vector<8x32xf32> to vector<8x24xf32>
    %40 = arith.negf %39 : vector<8x24xf32>
    %41 = math.exp %40 : vector<8x24xf32>
    %cst_21 = arith.constant 1.000000e+00 : f32
    %42 = vector.broadcast %cst_21 : f32 to vector<8x24xf32>
    %43 = arith.addf %42, %41 : vector<8x24xf32>
    %44 = arith.divf %42, %43 : vector<8x24xf32>
    %45 = vector.extract_strided_slice %38 {offsets = [0, 24], sizes = [8, 8], strides = [1, 1]} : vector<8x32xf32> to vector<8x8xf32>
    %46 = math.tanh %45 : vector<8x8xf32>
    %47 = vector.extract_strided_slice %44 {offsets = [0, 0], sizes = [8, 8], strides = [1, 1]} : vector<8x24xf32> to vector<8x8xf32>
    %48 = vector.extract_strided_slice %44 {offsets = [0, 8], sizes = [8, 8], strides = [1, 1]} : vector<8x24xf32> to vector<8x8xf32>
    %49 = vector.extract_strided_slice %44 {offsets = [0, 16], sizes = [8, 8], strides = [1, 1]} : vector<8x24xf32> to vector<8x8xf32>
    %50 = arith.mulf %48, %15 : vector<8x8xf32>
    %51 = arith.mulf %47, %46 : vector<8x8xf32>
    %52 = arith.addf %50, %51 : vector<8x8xf32>
    %53 = math.tanh %52 : vector<8x8xf32>
    %54 = arith.mulf %49, %53 : vector<8x8xf32>
    %55 = vector.extract_strided_slice %2 {offsets = [0, 0], sizes = [1, 8], strides = [1, 1]} : vector<5x8xf32> to vector<1x8xf32>
    %56 = vector.broadcast %55 : vector<1x8xf32> to vector<8x8xf32>
    %57 = arith.mulf %54, %56 : vector<8x8xf32>
    %58 = arith.addf %16, %57 : vector<8x8xf32>
    %59 = vector.extract_strided_slice %8 {offsets = [8, 0], sizes = [8, 32], strides = [1, 1]} : vector<40x32xf32> to vector<8x32xf32>
    %cst_22 = arith.constant dense<0.000000e+00> : vector<8x32xf32>
    %60 = tpu.matmul %35, %0, %cst_22 {dimension_numbers = #tpu.dot_dimension_numbers<[1], [0], [0], [1], [0, 0, 1, 1], [], []>} : vector<8x8xf32>, vector<8x32xf32>, vector<8x32xf32> -> vector<8x32xf32>
    %61 = arith.addf %59, %60 : vector<8x32xf32>
    %62 = vector.extract_strided_slice %61 {offsets = [0, 0], sizes = [8, 24], strides = [1, 1]} : vector<8x32xf32> to vector<8x24xf32>
    %63 = arith.negf %62 : vector<8x24xf32>
    %64 = math.exp %63 : vector<8x24xf32>
    %cst_23 = arith.constant 1.000000e+00 : f32
    %65 = vector.broadcast %cst_23 : f32 to vector<8x24xf32>
    %66 = arith.addf %65, %64 : vector<8x24xf32>
    %67 = arith.divf %65, %66 : vector<8x24xf32>
    %68 = vector.extract_strided_slice %61 {offsets = [0, 24], sizes = [8, 8], strides = [1, 1]} : vector<8x32xf32> to vector<8x8xf32>
    %69 = math.tanh %68 : vector<8x8xf32>
    %70 = vector.extract_strided_slice %67 {offsets = [0, 0], sizes = [8, 8], strides = [1, 1]} : vector<8x24xf32> to vector<8x8xf32>
    %71 = vector.extract_strided_slice %67 {offsets = [0, 8], sizes = [8, 8], strides = [1, 1]} : vector<8x24xf32> to vector<8x8xf32>
    %72 = vector.extract_strided_slice %67 {offsets = [0, 16], sizes = [8, 8], strides = [1, 1]} : vector<8x24xf32> to vector<8x8xf32>
    %73 = arith.mulf %71, %33 : vector<8x8xf32>
    %74 = arith.mulf %70, %69 : vector<8x8xf32>
    %75 = arith.addf %73, %74 : vector<8x8xf32>
    %76 = math.tanh %75 : vector<8x8xf32>
    %77 = arith.mulf %72, %76 : vector<8x8xf32>
    %78 = tpu.concatenate %77, %54 in 1 : vector<8x8xf32>, vector<8x8xf32> -> vector<8x16xf32>
    %cst_24 = arith.constant dense<0.000000e+00> : vector<8x32xf32>
    %79 = tpu.matmul %78, %1, %cst_24 {dimension_numbers = #tpu.dot_dimension_numbers<[1], [0], [0], [1], [0, 0, 1, 1], [], []>} : vector<8x16xf32>, vector<16x32xf32>, vector<8x32xf32> -> vector<8x32xf32>
    %80 = arith.addf %79, %11 : vector<8x32xf32>
    %81 = vector.extract_strided_slice %80 {offsets = [0, 0], sizes = [8, 24], strides = [1, 1]} : vector<8x32xf32> to vector<8x24xf32>
    %82 = arith.negf %81 : vector<8x24xf32>
    %83 = math.exp %82 : vector<8x24xf32>
    %cst_25 = arith.constant 1.000000e+00 : f32
    %84 = vector.broadcast %cst_25 : f32 to vector<8x24xf32>
    %85 = arith.addf %84, %83 : vector<8x24xf32>
    %86 = arith.divf %84, %85 : vector<8x24xf32>
    %87 = vector.extract_strided_slice %80 {offsets = [0, 24], sizes = [8, 8], strides = [1, 1]} : vector<8x32xf32> to vector<8x8xf32>
    %88 = math.tanh %87 : vector<8x8xf32>
    %89 = vector.extract_strided_slice %86 {offsets = [0, 0], sizes = [8, 8], strides = [1, 1]} : vector<8x24xf32> to vector<8x8xf32>
    %90 = vector.extract_strided_slice %86 {offsets = [0, 8], sizes = [8, 8], strides = [1, 1]} : vector<8x24xf32> to vector<8x8xf32>
    %91 = vector.extract_strided_slice %86 {offsets = [0, 16], sizes = [8, 8], strides = [1, 1]} : vector<8x24xf32> to vector<8x8xf32>
    %92 = arith.mulf %90, %52 : vector<8x8xf32>
    %93 = arith.mulf %89, %88 : vector<8x8xf32>
    %94 = arith.addf %92, %93 : vector<8x8xf32>
    %95 = math.tanh %94 : vector<8x8xf32>
    %96 = arith.mulf %91, %95 : vector<8x8xf32>
    %97 = vector.extract_strided_slice %2 {offsets = [1, 0], sizes = [1, 8], strides = [1, 1]} : vector<5x8xf32> to vector<1x8xf32>
    %98 = vector.broadcast %97 : vector<1x8xf32> to vector<8x8xf32>
    %99 = arith.mulf %96, %98 : vector<8x8xf32>
    %100 = arith.addf %58, %99 : vector<8x8xf32>
    %101 = vector.extract_strided_slice %8 {offsets = [16, 0], sizes = [8, 32], strides = [1, 1]} : vector<40x32xf32> to vector<8x32xf32>
    %cst_26 = arith.constant dense<0.000000e+00> : vector<8x32xf32>
    %102 = tpu.matmul %77, %0, %cst_26 {dimension_numbers = #tpu.dot_dimension_numbers<[1], [0], [0], [1], [0, 0, 1, 1], [], []>} : vector<8x8xf32>, vector<8x32xf32>, vector<8x32xf32> -> vector<8x32xf32>
    %103 = arith.addf %101, %102 : vector<8x32xf32>
    %104 = vector.extract_strided_slice %103 {offsets = [0, 0], sizes = [8, 24], strides = [1, 1]} : vector<8x32xf32> to vector<8x24xf32>
    %105 = arith.negf %104 : vector<8x24xf32>
    %106 = math.exp %105 : vector<8x24xf32>
    %cst_27 = arith.constant 1.000000e+00 : f32
    %107 = vector.broadcast %cst_27 : f32 to vector<8x24xf32>
    %108 = arith.addf %107, %106 : vector<8x24xf32>
    %109 = arith.divf %107, %108 : vector<8x24xf32>
    %110 = vector.extract_strided_slice %103 {offsets = [0, 24], sizes = [8, 8], strides = [1, 1]} : vector<8x32xf32> to vector<8x8xf32>
    %111 = math.tanh %110 : vector<8x8xf32>
    %112 = vector.extract_strided_slice %109 {offsets = [0, 0], sizes = [8, 8], strides = [1, 1]} : vector<8x24xf32> to vector<8x8xf32>
    %113 = vector.extract_strided_slice %109 {offsets = [0, 8], sizes = [8, 8], strides = [1, 1]} : vector<8x24xf32> to vector<8x8xf32>
    %114 = vector.extract_strided_slice %109 {offsets = [0, 16], sizes = [8, 8], strides = [1, 1]} : vector<8x24xf32> to vector<8x8xf32>
    %115 = arith.mulf %113, %75 : vector<8x8xf32>
    %116 = arith.mulf %112, %111 : vector<8x8xf32>
    %117 = arith.addf %115, %116 : vector<8x8xf32>
    %118 = math.tanh %117 : vector<8x8xf32>
    %119 = arith.mulf %114, %118 : vector<8x8xf32>
    %120 = tpu.concatenate %119, %96 in 1 : vector<8x8xf32>, vector<8x8xf32> -> vector<8x16xf32>
    %cst_28 = arith.constant dense<0.000000e+00> : vector<8x32xf32>
    %121 = tpu.matmul %120, %1, %cst_28 {dimension_numbers = #tpu.dot_dimension_numbers<[1], [0], [0], [1], [0, 0, 1, 1], [], []>} : vector<8x16xf32>, vector<16x32xf32>, vector<8x32xf32> -> vector<8x32xf32>
    %122 = arith.addf %121, %11 : vector<8x32xf32>
    %123 = vector.extract_strided_slice %122 {offsets = [0, 0], sizes = [8, 24], strides = [1, 1]} : vector<8x32xf32> to vector<8x24xf32>
    %124 = arith.negf %123 : vector<8x24xf32>
    %125 = math.exp %124 : vector<8x24xf32>
    %cst_29 = arith.constant 1.000000e+00 : f32
    %126 = vector.broadcast %cst_29 : f32 to vector<8x24xf32>
    %127 = arith.addf %126, %125 : vector<8x24xf32>
    %128 = arith.divf %126, %127 : vector<8x24xf32>
    %129 = vector.extract_strided_slice %122 {offsets = [0, 24], sizes = [8, 8], strides = [1, 1]} : vector<8x32xf32> to vector<8x8xf32>
    %130 = math.tanh %129 : vector<8x8xf32>
    %131 = vector.extract_strided_slice %128 {offsets = [0, 0], sizes = [8, 8], strides = [1, 1]} : vector<8x24xf32> to vector<8x8xf32>
    %132 = vector.extract_strided_slice %128 {offsets = [0, 8], sizes = [8, 8], strides = [1, 1]} : vector<8x24xf32> to vector<8x8xf32>
    %133 = vector.extract_strided_slice %128 {offsets = [0, 16], sizes = [8, 8], strides = [1, 1]} : vector<8x24xf32> to vector<8x8xf32>
    %134 = arith.mulf %132, %94 : vector<8x8xf32>
    %135 = arith.mulf %131, %130 : vector<8x8xf32>
    %136 = arith.addf %134, %135 : vector<8x8xf32>
    %137 = math.tanh %136 : vector<8x8xf32>
    %138 = arith.mulf %133, %137 : vector<8x8xf32>
    %139 = vector.extract_strided_slice %2 {offsets = [2, 0], sizes = [1, 8], strides = [1, 1]} : vector<5x8xf32> to vector<1x8xf32>
    %140 = vector.broadcast %139 : vector<1x8xf32> to vector<8x8xf32>
    %141 = arith.mulf %138, %140 : vector<8x8xf32>
    %142 = arith.addf %100, %141 : vector<8x8xf32>
    %143 = vector.extract_strided_slice %8 {offsets = [24, 0], sizes = [8, 32], strides = [1, 1]} : vector<40x32xf32> to vector<8x32xf32>
    %cst_30 = arith.constant dense<0.000000e+00> : vector<8x32xf32>
    %144 = tpu.matmul %119, %0, %cst_30 {dimension_numbers = #tpu.dot_dimension_numbers<[1], [0], [0], [1], [0, 0, 1, 1], [], []>} : vector<8x8xf32>, vector<8x32xf32>, vector<8x32xf32> -> vector<8x32xf32>
    %145 = arith.addf %143, %144 : vector<8x32xf32>
    %146 = vector.extract_strided_slice %145 {offsets = [0, 0], sizes = [8, 24], strides = [1, 1]} : vector<8x32xf32> to vector<8x24xf32>
    %147 = arith.negf %146 : vector<8x24xf32>
    %148 = math.exp %147 : vector<8x24xf32>
    %cst_31 = arith.constant 1.000000e+00 : f32
    %149 = vector.broadcast %cst_31 : f32 to vector<8x24xf32>
    %150 = arith.addf %149, %148 : vector<8x24xf32>
    %151 = arith.divf %149, %150 : vector<8x24xf32>
    %152 = vector.extract_strided_slice %145 {offsets = [0, 24], sizes = [8, 8], strides = [1, 1]} : vector<8x32xf32> to vector<8x8xf32>
    %153 = math.tanh %152 : vector<8x8xf32>
    %154 = vector.extract_strided_slice %151 {offsets = [0, 0], sizes = [8, 8], strides = [1, 1]} : vector<8x24xf32> to vector<8x8xf32>
    %155 = vector.extract_strided_slice %151 {offsets = [0, 8], sizes = [8, 8], strides = [1, 1]} : vector<8x24xf32> to vector<8x8xf32>
    %156 = vector.extract_strided_slice %151 {offsets = [0, 16], sizes = [8, 8], strides = [1, 1]} : vector<8x24xf32> to vector<8x8xf32>
    %157 = arith.mulf %155, %117 : vector<8x8xf32>
    %158 = arith.mulf %154, %153 : vector<8x8xf32>
    %159 = arith.addf %157, %158 : vector<8x8xf32>
    %160 = math.tanh %159 : vector<8x8xf32>
    %161 = arith.mulf %156, %160 : vector<8x8xf32>
    %162 = tpu.concatenate %161, %138 in 1 : vector<8x8xf32>, vector<8x8xf32> -> vector<8x16xf32>
    %cst_32 = arith.constant dense<0.000000e+00> : vector<8x32xf32>
    %163 = tpu.matmul %162, %1, %cst_32 {dimension_numbers = #tpu.dot_dimension_numbers<[1], [0], [0], [1], [0, 0, 1, 1], [], []>} : vector<8x16xf32>, vector<16x32xf32>, vector<8x32xf32> -> vector<8x32xf32>
    %164 = arith.addf %163, %11 : vector<8x32xf32>
    %165 = vector.extract_strided_slice %164 {offsets = [0, 0], sizes = [8, 24], strides = [1, 1]} : vector<8x32xf32> to vector<8x24xf32>
    %166 = arith.negf %165 : vector<8x24xf32>
    %167 = math.exp %166 : vector<8x24xf32>
    %cst_33 = arith.constant 1.000000e+00 : f32
    %168 = vector.broadcast %cst_33 : f32 to vector<8x24xf32>
    %169 = arith.addf %168, %167 : vector<8x24xf32>
    %170 = arith.divf %168, %169 : vector<8x24xf32>
    %171 = vector.extract_strided_slice %164 {offsets = [0, 24], sizes = [8, 8], strides = [1, 1]} : vector<8x32xf32> to vector<8x8xf32>
    %172 = math.tanh %171 : vector<8x8xf32>
    %173 = vector.extract_strided_slice %170 {offsets = [0, 0], sizes = [8, 8], strides = [1, 1]} : vector<8x24xf32> to vector<8x8xf32>
    %174 = vector.extract_strided_slice %170 {offsets = [0, 8], sizes = [8, 8], strides = [1, 1]} : vector<8x24xf32> to vector<8x8xf32>
    %175 = vector.extract_strided_slice %170 {offsets = [0, 16], sizes = [8, 8], strides = [1, 1]} : vector<8x24xf32> to vector<8x8xf32>
    %176 = arith.mulf %174, %136 : vector<8x8xf32>
    %177 = arith.mulf %173, %172 : vector<8x8xf32>
    %178 = arith.addf %176, %177 : vector<8x8xf32>
    %179 = math.tanh %178 : vector<8x8xf32>
    %180 = arith.mulf %175, %179 : vector<8x8xf32>
    %181 = vector.extract_strided_slice %2 {offsets = [3, 0], sizes = [1, 8], strides = [1, 1]} : vector<5x8xf32> to vector<1x8xf32>
    %182 = vector.broadcast %181 : vector<1x8xf32> to vector<8x8xf32>
    %183 = arith.mulf %180, %182 : vector<8x8xf32>
    %184 = arith.addf %142, %183 : vector<8x8xf32>
    %185 = vector.extract_strided_slice %8 {offsets = [32, 0], sizes = [8, 32], strides = [1, 1]} : vector<40x32xf32> to vector<8x32xf32>
    %cst_34 = arith.constant dense<0.000000e+00> : vector<8x32xf32>
    %186 = tpu.matmul %161, %0, %cst_34 {dimension_numbers = #tpu.dot_dimension_numbers<[1], [0], [0], [1], [0, 0, 1, 1], [], []>} : vector<8x8xf32>, vector<8x32xf32>, vector<8x32xf32> -> vector<8x32xf32>
    %187 = arith.addf %185, %186 : vector<8x32xf32>
    %188 = vector.extract_strided_slice %187 {offsets = [0, 0], sizes = [8, 24], strides = [1, 1]} : vector<8x32xf32> to vector<8x24xf32>
    %189 = arith.negf %188 : vector<8x24xf32>
    %190 = math.exp %189 : vector<8x24xf32>
    %cst_35 = arith.constant 1.000000e+00 : f32
    %191 = vector.broadcast %cst_35 : f32 to vector<8x24xf32>
    %192 = arith.addf %191, %190 : vector<8x24xf32>
    %193 = arith.divf %191, %192 : vector<8x24xf32>
    %194 = vector.extract_strided_slice %187 {offsets = [0, 24], sizes = [8, 8], strides = [1, 1]} : vector<8x32xf32> to vector<8x8xf32>
    %195 = math.tanh %194 : vector<8x8xf32>
    %196 = vector.extract_strided_slice %193 {offsets = [0, 0], sizes = [8, 8], strides = [1, 1]} : vector<8x24xf32> to vector<8x8xf32>
    %197 = vector.extract_strided_slice %193 {offsets = [0, 8], sizes = [8, 8], strides = [1, 1]} : vector<8x24xf32> to vector<8x8xf32>
    %198 = vector.extract_strided_slice %193 {offsets = [0, 16], sizes = [8, 8], strides = [1, 1]} : vector<8x24xf32> to vector<8x8xf32>
    %199 = arith.mulf %197, %159 : vector<8x8xf32>
    %200 = arith.mulf %196, %195 : vector<8x8xf32>
    %201 = arith.addf %199, %200 : vector<8x8xf32>
    %202 = math.tanh %201 : vector<8x8xf32>
    %203 = arith.mulf %198, %202 : vector<8x8xf32>
    %204 = tpu.concatenate %203, %180 in 1 : vector<8x8xf32>, vector<8x8xf32> -> vector<8x16xf32>
    %cst_36 = arith.constant dense<0.000000e+00> : vector<8x32xf32>
    %205 = tpu.matmul %204, %1, %cst_36 {dimension_numbers = #tpu.dot_dimension_numbers<[1], [0], [0], [1], [0, 0, 1, 1], [], []>} : vector<8x16xf32>, vector<16x32xf32>, vector<8x32xf32> -> vector<8x32xf32>
    %206 = arith.addf %205, %11 : vector<8x32xf32>
    %207 = vector.extract_strided_slice %206 {offsets = [0, 0], sizes = [8, 24], strides = [1, 1]} : vector<8x32xf32> to vector<8x24xf32>
    %208 = arith.negf %207 : vector<8x24xf32>
    %209 = math.exp %208 : vector<8x24xf32>
    %cst_37 = arith.constant 1.000000e+00 : f32
    %210 = vector.broadcast %cst_37 : f32 to vector<8x24xf32>
    %211 = arith.addf %210, %209 : vector<8x24xf32>
    %212 = arith.divf %210, %211 : vector<8x24xf32>
    %213 = vector.extract_strided_slice %206 {offsets = [0, 24], sizes = [8, 8], strides = [1, 1]} : vector<8x32xf32> to vector<8x8xf32>
    %214 = math.tanh %213 : vector<8x8xf32>
    %215 = vector.extract_strided_slice %212 {offsets = [0, 0], sizes = [8, 8], strides = [1, 1]} : vector<8x24xf32> to vector<8x8xf32>
    %216 = vector.extract_strided_slice %212 {offsets = [0, 8], sizes = [8, 8], strides = [1, 1]} : vector<8x24xf32> to vector<8x8xf32>
    %217 = vector.extract_strided_slice %212 {offsets = [0, 16], sizes = [8, 8], strides = [1, 1]} : vector<8x24xf32> to vector<8x8xf32>
    %218 = arith.mulf %216, %178 : vector<8x8xf32>
    %219 = arith.mulf %215, %214 : vector<8x8xf32>
    %220 = arith.addf %218, %219 : vector<8x8xf32>
    %221 = math.tanh %220 : vector<8x8xf32>
    %222 = arith.mulf %217, %221 : vector<8x8xf32>
    %223 = vector.extract_strided_slice %2 {offsets = [4, 0], sizes = [1, 8], strides = [1, 1]} : vector<5x8xf32> to vector<1x8xf32>
    %224 = vector.broadcast %223 : vector<1x8xf32> to vector<8x8xf32>
    %225 = arith.mulf %222, %224 : vector<8x8xf32>
    %226 = arith.addf %184, %225 : vector<8x8xf32>
    %cst_38 = arith.constant dense<0.000000e+00> : vector<8xf32>
    %227 = vector.multi_reduction <add>, %226, %cst_38 [1] : vector<8x8xf32> to vector<8xf32>
    %228 = vector.shape_cast %227 : vector<8xf32> to vector<8x1xf32>
    %c0_39 = arith.constant 0 : index
    %c0_40 = arith.constant 0 : index
    %229 = vector.load %arg7[%c0_39, %c0_40] : memref<1x1xf32, #tpu.memory_space<vmem>>, vector<1x1xf32>
    %230 = vector.broadcast %229 : vector<1x1xf32> to vector<8x1xf32>
    %231 = arith.addf %228, %230 : vector<8x1xf32>
    %232 = arith.negf %231 : vector<8x1xf32>
    %233 = math.exp %232 : vector<8x1xf32>
    %cst_41 = arith.constant 1.000000e+00 : f32
    %234 = vector.broadcast %cst_41 : f32 to vector<8x1xf32>
    %235 = arith.addf %234, %233 : vector<8x1xf32>
    %236 = arith.divf %234, %235 : vector<8x1xf32>
    %c0_42 = arith.constant 0 : index
    %c0_43 = arith.constant 0 : index
    %237 = vector.load %arg8[%c0_42, %c0_43] : memref<8x1xf32, #tpu.memory_space<vmem>>, vector<8x1xf32>
    tpu.vector_store %arg8[%c0_42, %c0_43], %236 {strides = array<i32>} : memref<8x1xf32, #tpu.memory_space<vmem>>, vector<8x1xf32>,
    return
  }
}

</mosaic_0001>

<bundles_post_ra>
// kernel: tpu_custom_call.1
= control target key start
LH: loop header
LB: loop body
LE: loop exit
PB: predicated region body
PF: predicated region fallthrough
CT: control target
= control target key end

     0   :  { %vm61_vm0 = vcmask 1043456   ;;  %vm45_vm1 = vcmask 31744   ;;  %v937_v3 = vmov 0.0   ;;  %s940_s16 = smov 112   ;;  %vm101_vm6 = vcmask 64512   ;;  %s942_s27 = smov 16   ;;  %s1177_s1 = inlined_call_operand.vmem [shape: f32[4,32], index: 1, kind: input, shape index: {}]   ;;  %s1178_s0 = inlined_call_operand.vmem [shape: f32[40,4], index: 0, kind: input, shape index: {}]   ;;  %s1179_s2 = inlined_call_operand.vmem [shape: f32[8,32], index: 2, kind: input, shape index: {}]   ;;  %s1180_s3 = inlined_call_operand.vmem [shape: f32[1,32], index: 3, kind: input, shape index: {}]   ;;  %s1181_s4 = inlined_call_operand.vmem [shape: f32[16,32], index: 4, kind: input, shape index: {}]   ;;  %s1182_s5 = inlined_call_operand.vmem [shape: f32[1,32], index: 5, kind: input, shape index: {}]   ;;  %s1183_s6 = inlined_call_operand.vmem [shape: f32[5,8], index: 6, kind: input, shape index: {}]   ;;  %s1184_s7 = inlined_call_operand.<no memory space> [shape: f32[1,1], index: 7, kind: input, shape index: {}]   ;;  %s1185_s8 = inlined_call_operand.vmem [shape: f32[8,1], index: 8, kind: output, shape index: {}]  }
   0x1   :  { %v40_v0 = vld [vmem:[%s1177_s1] sm:$0xf]  ;;  %v1020_v30 = vld [vmem:[%s1181_s4 + $0x8] sm:$0xff]  ;;  %vm168_vm7 = vcmask 130048  }
   0x2   :  { %v35_v1 = vld [vmem:[%s1178_s0] sm:$0xff]  ;;  %817 = vmatpush.msk.msra.mxu0 %vm61_vm0, %v40_v0  ;;  %843 = vmatpush.msk.msra.mxu3 %vm61_vm0, %v40_v0  ;;  %v36_v34 = vld [vmem:[%s1178_s0 + $0x8] sm:$0xff] }
   0x3   :  { %v997_v2 = vld [vmem:[%s1179_s2] sm:$0xff]  ;;  %818 = vmatmul.msk.f32.vlgmr.msra.gmra.mxu0 %vm45_vm1, %v35_v1  ;;  %s938_s2 = smov 104   ;;  %186 = vmatpush.msra.mxu2 %v1020_v30 }
   0x4   :  { %120 = vmatpush.msra.mxu1 %v997_v2  ;;  %253 = vmatpush.msrb.mxu3 %v997_v2  ;;  %v1005_v4 = vld [vmem:[%s1180_s3] ss:$0 sm:$0xff]  ;;  %s939_s3 = smov 8  }
   0x5   :  { %121 = vmatmul.f32.vlgmr.msra.gmra.mxu1 %v937_v3  ;;  %v39_v29 = vld [vmem:[%s1178_s0 + $0x20] sm:$0xff] }
   0x6   :  { %822 = vmatmul.msk.f32.vlgmr.msra.gmra.mxu3 %vm45_vm1, %v39_v29  ;;  %322 = vmatpush.msrb.mxu1 %v1020_v30  ;;  %v1030_v33 = vld [vmem:[%s1181_s4] sm:$0xff] }
   0x7   :  { %389 = vmatpush.msra.mxu3 %v997_v2  ;;  %187 = vmatpush.msra.mxu2 %v1030_v33  ;;  %v1053_v42 = vld [vmem:[%s1182_s5] ss:$0 sm:$0xff]  ;;  %s941_s5 = smov 120  }
   0x8   :  { %323 = vmatpush.msrb.mxu1 %v1030_v33 }
   0x9   :  { %458 = vmatpush.msrb.mxu2 %v1020_v30 }
   0xa   :  { %525 = vmatpush.msra.mxu1 %v997_v2 }
   0xb   :  { %819 = vmatmul.msk.f32.gmra.mxu0 %vm45_vm1, %v36_v34  ;;  %459 = vmatpush.msrb.mxu2 %v1030_v33 }
  0x80   :  { %v82_v5 = vpop.f32.mrf.mxu0 }
  0x81   :  { %v83_v7 = vadd.f32 %v1005_v4, %v82_v5 }
  0x82   :  { %v122_v6 = vpop.f32.mrf.mxu1 }
  0x83   :  { %v125_v8 = vadd.f32 %v122_v6, %v83_v7 }
  0x85   :  { %853 = vtanh.f32 %v125_v8  ;;  %v823_v10 = vmul.f32 -1.442695, %v125_v8 }
  0x87   :  { %855 = vpow2.f32 %v823_v10 }
  0x88   :  { %v85_v38 = vpop.f32.mrf.mxu0 }
  0x89   :  { %v1047_v37 = vpop.f32.mrf.mxu3  ;;  %v86_v39 = vadd.f32 %v1005_v4, %v85_v38 }
  0x8b   :  { %v854_v9 = vpop.eup %853 }
  0x8c   :  { %148 = vrot.lane.b32.xlu0 %v854_v9, %s938_s2 }
  0x8d   :  { %v856_v11 = vpop.eup %855 }
  0x8e   :  { %v129_v12 = vadd.f32 1.0, %v856_v11 }
  0x90   :  { %857 = vrcp.f32 %v129_v12  ;;  %v141_v18 = vand.u32 2147483648, %v129_v12  ;;  %vm135_vm3 = vweird.f32 %v129_v12  ;;  %v139_v19 = vand.u32 2147483647, %v129_v12 }
  0x92   :  { %v142_v21 = vor.u32 1.1754944e-38, %v141_v18  ;;  %vm140_vm5 = vcmp.eq.f32.partialorder %v139_v19, 8.507059e+37 }
  0x96   :  { %v858_v13 = vpop.eup %857 }
  0x97   :  { %v131_v14 = vmul.f32 %v858_v13, %v129_v12  ;;  %vm136_vm2 = vweird.f32 %v858_v13 }
  0x98   :  { %vm137_vm4 = vmor %vm135_vm3, %vm136_vm2 }
  0x99   :  { %v132_v15 = vsub.f32 1.0, %v131_v14 }
  0x9b   :  { %v133_v16 = vmul.f32 %v858_v13, %v132_v15 }
  0x9d   :  { %v134_v17 = vadd.f32 %v858_v13, %v133_v16 }
  0x9f   :  { %v138_v20 = vsel %vm137_vm4, %v858_v13, %v134_v17 }
  0xa0   :  { %v143_v23 = vsel %vm140_vm5, %v142_v21, %v138_v20 }
  0xa1   :  { %v146_v25 = vmul.f32 0.0, %v143_v23 }
  0xfe   :  { %v149_v22 = vpop.permute.xlu0 %148 }
  0xff   :  { %v151_v24 = vmul.f32 %v149_v22, %v143_v23 }
 0x101   :  { %153 = vrot.lane.b32.xlu0 %v151_v24, %s939_s3 }
 0x173   :  { %v154_v26 = vpop.permute.xlu0 %153 }
 0x174   :  { %v1010_v27 = vadd.f32 %v154_v26, %v146_v25  ;;  %v37_v26 = vld [vmem:[%s1178_s0 + $0x10] sm:$0xff] }
 0x175   :  { %820 = vmatmul.msk.f32.gmra.mxu0 %vm45_vm1, %v37_v26 }
 0x176   :  { %859 = vtanh.f32 %v1010_v27 }
 0x17c   :  { %v860_v28 = vpop.eup %859 }
 0x17d   :  { %159 = vrot.lane.b32.xlu1 %v860_v28, %s939_s3 }
 0x1ef   :  { %v160_v31 = vpop.permute.xlu1 %159 }
 0x1f0   :  { %v162_v32 = vmul.f32 %v160_v31, %v143_v23 }
 0x1f2   :  { %164 = vrot.lane.b32.xlu1 %v162_v32, %s940_s16  ;;  %v88_v31 = vpop.f32.mrf.mxu0 }
 0x1f3   :  { %v89_v32 = vadd.f32 %v1005_v4, %v88_v31 }
 0x264   :  { %v165_v35 = vpop.permute.xlu1 %164 }
 0x265   :  { %826 = vmatmul.msk.f32.vlgmr.msrb.gmra.mxu3 %vm101_vm6, %v165_v35  ;;  %v167_v36 = vsel %vm101_vm6, %v165_v35, 0.0 }
 0x266   :  { %824 = vmatmul.msk.f32.vlgmr.msra.gmra.mxu2 %vm168_vm7, %v167_v36  ;;  %594 = vmatpush.msrb.mxu3 %v1020_v30 }
 0x267   :  { %661 = vmatpush.msra.mxu2 %v997_v2 }
 0x268   :  { %595 = vmatpush.msrb.mxu3 %v1030_v33 }
 0x2e8   :  { %v255_v40 = vpop.f32.mrf.mxu3 }
 0x2e9   :  { %v258_v41 = vadd.f32 %v255_v40, %v86_v39  ;;  %v189_v43 = vpop.f32.mrf.mxu2 }
 0x2ea   :  { %v190_v44 = vadd.f32 %v1053_v42, %v189_v43 }
 0x2eb   :  { %861 = vtanh.f32 %v258_v41  ;;  %v827_v47 = vmul.f32 -1.442695, %v258_v41 }
 0x2ec   :  { %863 = vtanh.f32 %v190_v44  ;;  %v825_v48 = vmul.f32 -1.442695, %v190_v44 }
 0x2ed   :  { %865 = vpow2.f32 %v827_v47 }
 0x2ee   :  { %867 = vpow2.f32 %v825_v48 }
 0x2f1   :  { %v862_v45 = vpop.eup %861 }
 0x2f2   :  { %281 = vrot.lane.b32.xlu2 %v862_v45, %s938_s2  ;;  %v864_v46 = vpop.eup %863 }
 0x2f3   :  { %v866_v49 = vpop.eup %865 }
 0x2f4   :  { %v262_v50 = vadd.f32 1.0, %v866_v49  ;;  %v868_v51 = vpop.eup %867 }
 0x2f5   :  { %v195_v52 = vadd.f32 1.0, %v868_v51 }
 0x2f6   :  { %869 = vrcp.f32 %v262_v50  ;;  %v274_v61 = vand.u32 2147483648, %v262_v50  ;;  %vm268_vm9 = vweird.f32 %v262_v50  ;;  %v272_v62 = vand.u32 2147483647, %v262_v50 }
 0x2f7   :  { %871 = vrcp.f32 %v195_v52  ;;  %v207_v7 = vand.u32 2147483648, %v195_v52  ;;  %vm201_vm13 = vweird.f32 %v195_v52  ;;  %v205_v8 = vand.u32 2147483647, %v195_v52 }
 0x2f8   :  { %v275_v1 = vor.u32 1.1754944e-38, %v274_v61  ;;  %vm273_vm11 = vcmp.eq.f32.partialorder %v272_v62, 8.507059e+37 }
 0x2f9   :  { %v208_v10 = vor.u32 1.1754944e-38, %v207_v7  ;;  %vm206_vm15 = vcmp.eq.f32.partialorder %v205_v8, 8.507059e+37 }
 0x2fa   :  { %214 = vrot.lane.b32.xlu2 %v864_v46, %s938_s2 }
 0x2fc   :  { %v870_v53 = vpop.eup %869 }
 0x2fd   :  { %v264_v54 = vmul.f32 %v870_v53, %v262_v50  ;;  %v872_v56 = vpop.eup %871  ;;  %vm269_vm8 = vweird.f32 %v870_v53 }
 0x2fe   :  { %v197_v58 = vmul.f32 %v872_v56, %v195_v52  ;;  %vm270_vm10 = vmor %vm268_vm9, %vm269_vm8  ;;  %vm202_vm12 = vweird.f32 %v872_v56 }
 0x2ff   :  { %v265_v55 = vsub.f32 1.0, %v264_v54  ;;  %vm203_vm14 = vmor %vm201_vm13, %vm202_vm12 }
 0x300   :  { %v198_v60 = vsub.f32 1.0, %v197_v58 }
 0x301   :  { %v266_v57 = vmul.f32 %v870_v53, %v265_v55 }
 0x302   :  { %v199_v0 = vmul.f32 %v872_v56, %v198_v60 }
 0x303   :  { %v267_v59 = vadd.f32 %v870_v53, %v266_v57 }
 0x304   :  { %v200_v6 = vadd.f32 %v872_v56, %v199_v0 }
 0x305   :  { %v271_v63 = vsel %vm270_vm10, %v870_v53, %v267_v59 }
 0x306   :  { %v276_v3 = vsel %vm273_vm11, %v275_v1, %v271_v63  ;;  %v204_v9 = vsel %vm203_vm14, %v872_v56, %v200_v6 }
 0x307   :  { %v209_v12 = vsel %vm206_vm15, %v208_v10, %v204_v9  ;;  %v279_v14 = vmul.f32 %v276_v3, %v1010_v27 }
 0x308   :  { %v212_v17 = vmul.f32 0.0, %v209_v12 }
 0x34c   :  { %v282_v2 = vpop.permute.xlu2 %281 }
 0x34d   :  { %v284_v5 = vmul.f32 %v282_v2, %v276_v3 }
 0x34f   :  { %286 = vrot.lane.b32.xlu0 %v284_v5, %s939_s3 }
 0x354   :  { %v215_v11 = vpop.permute.xlu2 %214 }
 0x355   :  { %v217_v13 = vmul.f32 %v215_v11, %v209_v12 }
 0x357   :  { %219 = vrot.lane.b32.xlu1 %v217_v13, %s939_s3 }
 0x3c1   :  { %v287_v15 = vpop.permute.xlu0 %286 }
 0x3c2   :  { %v1061_v16 = vadd.f32 %v287_v15, %v279_v14  ;;  %v38_v15 = vld [vmem:[%s1178_s0 + $0x18] sm:$0xff] }
 0x3c3   :  { %821 = vmatmul.msk.f32.gmra.mxu0 %vm45_vm1, %v38_v15 }
 0x3c4   :  { %873 = vtanh.f32 %v1061_v16 }
 0x3c9   :  { %v220_v18 = vpop.permute.xlu1 %219 }
 0x3ca   :  { %v874_v19 = vpop.eup %873  ;;  %v1064_v20 = vadd.f32 %v220_v18, %v212_v17 }
 0x3cb   :  { %292 = vrot.lane.b32.xlu2 %v874_v19, %s939_s3 }
 0x3cc   :  { %875 = vtanh.f32 %v1064_v20 }
 0x3d2   :  { %v876_v21 = vpop.eup %875 }
 0x3d3   :  { %225 = vrot.lane.b32.xlu0 %v876_v21, %s939_s3 }
 0x425   :  { %v293_v22 = vpop.permute.xlu2 %292 }
 0x426   :  { %v295_v23 = vmul.f32 %v293_v22, %v276_v3 }
 0x428   :  { %297 = vrot.lane.b32.xlu1 %v295_v23, %s940_s16 }
 0x440   :  { %v91_v23 = vpop.f32.mrf.mxu0 }
 0x445   :  { %v226_v24 = vpop.permute.xlu0 %225 }
 0x446   :  { %v1070_v25 = vmul.f32 %v226_v24, %v209_v12  ;;  %v92_v24 = vadd.f32 %v1005_v4, %v91_v23 }
 0x448   :  { %301 = vrot.lane.b32.xlu2 %v1070_v25, %s941_s5 }
 0x49a   :  { %v298_v27 = vpop.permute.xlu1 %297 }
 0x49b   :  { %830 = vmatmul.msk.f32.vlgmr.msra.gmra.mxu3 %vm101_vm6, %v298_v27 }
 0x4a2   :  { %v302_v28 = vpop.permute.xlu2 %301 }
 0x4a3   :  { %v304_v29 = vsel %vm101_vm6, %v298_v27, %v302_v28 }
 0x4a4   :  { %828 = vmatmul.msk.f32.vlgmr.msrb.gmra.mxu1 %vm168_vm7, %v304_v29 }
 0x4a5   :  { %730 = vmatpush.msrb.mxu1 %v1020_v30 }
 0x4a7   :  { %731 = vmatpush.msrb.mxu1 %v1030_v33 }
 0x51e   :  { %v391_v34 = vpop.f32.mrf.mxu3 }
 0x51f   :  { %v394_v35 = vadd.f32 %v391_v34, %v89_v32 }
 0x521   :  { %877 = vtanh.f32 %v394_v35  ;;  %v325_v36 = vpop.f32.mrf.mxu1  ;;  %v831_v41 = vmul.f32 -1.442695, %v394_v35 }
 0x522   :  { %v326_v38 = vadd.f32 %v1053_v42, %v325_v36 }
 0x524   :  { %879 = vtanh.f32 %v326_v38  ;;  %v829_v30 = vmul.f32 -1.442695, %v326_v38 }
 0x525   :  { %881 = vpow2.f32 %v831_v41 }
 0x526   :  { %883 = vpow2.f32 %v829_v30 }
 0x527   :  { %v878_v39 = vpop.eup %877 }
 0x528   :  { %417 = vrot.lane.b32.xlu1 %v878_v39, %s938_s2 }
 0x52a   :  { %v880_v40 = vpop.eup %879 }
 0x52b   :  { %350 = vrot.lane.b32.xlu0 %v880_v40, %s938_s2  ;;  %v882_v33 = vpop.eup %881 }
 0x52c   :  { %v884_v43 = vpop.eup %883  ;;  %v398_v44 = vadd.f32 1.0, %v882_v33 }
 0x52d   :  { %v331_v45 = vadd.f32 1.0, %v884_v43 }
 0x52e   :  { %885 = vrcp.f32 %v398_v44  ;;  %v410_v55 = vand.u32 2147483648, %v398_v44  ;;  %vm404_vm2 = vweird.f32 %v398_v44  ;;  %v408_v56 = vand.u32 2147483647, %v398_v44 }
 0x52f   :  { %887 = vrcp.f32 %v331_v45  ;;  %v343_v59 = vand.u32 2147483648, %v331_v45  ;;  %vm337_vm5 = vweird.f32 %v331_v45  ;;  %v341_v61 = vand.u32 2147483647, %v331_v45 }
 0x530   :  { %v411_v60 = vor.u32 1.1754944e-38, %v410_v55  ;;  %vm409_vm8 = vcmp.eq.f32.partialorder %v408_v56, 8.507059e+37 }
 0x531   :  { %v344_v2 = vor.u32 1.1754944e-38, %v343_v59  ;;  %vm342_vm10 = vcmp.eq.f32.partialorder %v341_v61, 8.507059e+37 }
 0x534   :  { %v886_v46 = vpop.eup %885 }
 0x535   :  { %v888_v47 = vpop.eup %887  ;;  %v400_v48 = vmul.f32 %v886_v46, %v398_v44  ;;  %vm405_vm0 = vweird.f32 %v886_v46 }
 0x536   :  { %v333_v49 = vmul.f32 %v888_v47, %v331_v45  ;;  %vm406_vm3 = vmor %vm404_vm2, %vm405_vm0  ;;  %vm338_vm4 = vweird.f32 %v888_v47 }
 0x537   :  { %v401_v50 = vsub.f32 1.0, %v400_v48  ;;  %vm339_vm9 = vmor %vm337_vm5, %vm338_vm4 }
 0x538   :  { %v334_v51 = vsub.f32 1.0, %v333_v49 }
 0x539   :  { %v402_v52 = vmul.f32 %v886_v46, %v401_v50 }
 0x53a   :  { %v335_v53 = vmul.f32 %v888_v47, %v334_v51 }
 0x53b   :  { %v403_v54 = vadd.f32 %v886_v46, %v402_v52 }
 0x53c   :  { %v336_v57 = vadd.f32 %v888_v47, %v335_v53 }
 0x53d   :  { %v407_v58 = vsel %vm406_vm3, %v886_v46, %v403_v54 }
 0x53e   :  { %v412_v63 = vsel %vm409_vm8, %v411_v60, %v407_v58  ;;  %v340_v0 = vsel %vm339_vm9, %v888_v47, %v336_v57 }
 0x53f   :  { %v345_v5 = vsel %vm342_vm10, %v344_v2, %v340_v0  ;;  %v415_v11 = vmul.f32 %v412_v63, %v1061_v16 }
 0x540   :  { %v348_v7 = vmul.f32 %v345_v5, %v1064_v20 }
 0x59a   :  { %v418_v62 = vpop.permute.xlu1 %417 }
 0x59b   :  { %v420_v1 = vmul.f32 %v418_v62, %v412_v63 }
 0x59d   :  { %422 = vrot.lane.b32.xlu0 %v420_v1, %s939_s3  ;;  %v351_v3 = vpop.permute.xlu0 %350 }
 0x59e   :  { %v353_v6 = vmul.f32 %v351_v3, %v345_v5 }
 0x5a0   :  { %355 = vrot.lane.b32.xlu2 %v353_v6, %s939_s3 }
 0x5fa   :  { %v356_v8 = vpop.permute.xlu2 %355 }
 0x5fb   :  { %v1090_v9 = vadd.f32 %v356_v8, %v348_v7 }
 0x5fd   :  { %889 = vtanh.f32 %v1090_v9 }
 0x603   :  { %v890_v10 = vpop.eup %889 }
 0x604   :  { %361 = vrot.lane.b32.xlu1 %v890_v10, %s939_s3 }
 0x60f   :  { %v423_v12 = vpop.permute.xlu0 %422 }
 0x610   :  { %v1095_v13 = vadd.f32 %v423_v12, %v415_v11 }
 0x612   :  { %891 = vtanh.f32 %v1095_v13 }
 0x618   :  { %v892_v14 = vpop.eup %891 }
 0x619   :  { %428 = vrot.lane.b32.xlu2 %v892_v14, %s939_s3 }
 0x673   :  { %v429_v17 = vpop.permute.xlu2 %428 }
 0x674   :  { %v431_v18 = vmul.f32 %v429_v17, %v412_v63  ;;  %v95_v17 = vadd.f32 %v1005_v4, %v1047_v37 }
 0x676   :  { %433 = vrot.lane.b32.xlu0 %v431_v18, %s940_s16  ;;  %v362_v19 = vpop.permute.xlu1 %361 }
 0x677   :  { %v1104_v16 = vmul.f32 %v362_v19, %v345_v5 }
 0x679   :  { %437 = vrot.lane.b32.xlu1 %v1104_v16, %s941_s5 }
 0x6e8   :  { %v434_v20 = vpop.permute.xlu0 %433 }
 0x6e9   :  { %834 = vmatmul.msk.f32.vlgmr.msra.gmra.mxu1 %vm101_vm6, %v434_v20 }
 0x6eb   :  { %v438_v21 = vpop.permute.xlu1 %437 }
 0x6ec   :  { %v440_v22 = vsel %vm101_vm6, %v434_v20, %v438_v21 }
 0x6ed   :  { %832 = vmatmul.msk.f32.vlgmr.msrb.gmra.mxu2 %vm168_vm7, %v440_v22 }
 0x766   :  { %v527_v26 = vpop.f32.mrf.mxu1 }
 0x767   :  { %v530_v27 = vadd.f32 %v527_v26, %v92_v24 }
 0x769   :  { %893 = vtanh.f32 %v530_v27  ;;  %v835_v38 = vmul.f32 -1.442695, %v530_v27 }
 0x76f   :  { %v894_v28 = vpop.eup %893 }
 0x770   :  { %553 = vrot.lane.b32.xlu0 %v894_v28, %s938_s2  ;;  %v461_v29 = vpop.f32.mrf.mxu2 }
 0x771   :  { %v462_v31 = vadd.f32 %v1053_v42, %v461_v29 }
 0x773   :  { %895 = vtanh.f32 %v462_v31  ;;  %v833_v34 = vmul.f32 -1.442695, %v462_v31 }
 0x775   :  { %897 = vpow2.f32 %v833_v34 }
 0x779   :  { %v896_v32 = vpop.eup %895 }
 0x77a   :  { %486 = vrot.lane.b32.xlu2 %v896_v32, %s938_s2 }
 0x77b   :  { %v898_v35 = vpop.eup %897 }
 0x77c   :  { %v467_v36 = vadd.f32 1.0, %v898_v35 }
 0x77e   :  { %899 = vrcp.f32 %v467_v36  ;;  %v479_v46 = vand.u32 2147483648, %v467_v36  ;;  %vm473_vm11 = vweird.f32 %v467_v36  ;;  %v477_v47 = vand.u32 2147483647, %v467_v36 }
 0x77f   :  { %901 = vpow2.f32 %v835_v38 }
 0x780   :  { %v480_v50 = vor.u32 1.1754944e-38, %v479_v46  ;;  %vm478_vm13 = vcmp.eq.f32.partialorder %v477_v47, 8.507059e+37 }
 0x784   :  { %v900_v39 = vpop.eup %899 }
 0x785   :  { %v902_v40 = vpop.eup %901  ;;  %v469_v41 = vmul.f32 %v900_v39, %v467_v36  ;;  %vm474_vm1 = vweird.f32 %v900_v39 }
 0x786   :  { %v534_v30 = vadd.f32 1.0, %v902_v40  ;;  %vm475_vm12 = vmor %vm473_vm11, %vm474_vm1 }
 0x787   :  { %v470_v33 = vsub.f32 1.0, %v469_v41 }
 0x788   :  { %903 = vrcp.f32 %v534_v30  ;;  %v546_v57 = vand.u32 2147483648, %v534_v30  ;;  %vm540_vm15 = vweird.f32 %v534_v30  ;;  %v544_v58 = vand.u32 2147483647, %v534_v30 }
 0x789   :  { %v471_v43 = vmul.f32 %v900_v39, %v470_v33 }
 0x78a   :  { %v547_v60 = vor.u32 1.1754944e-38, %v546_v57  ;;  %vm545_vm2 = vcmp.eq.f32.partialorder %v544_v58, 8.507059e+37 }
 0x78b   :  { %v472_v45 = vadd.f32 %v900_v39, %v471_v43 }
 0x78d   :  { %v476_v49 = vsel %vm475_vm12, %v900_v39, %v472_v45 }
 0x78e   :  { %v904_v44 = vpop.eup %903  ;;  %v481_v53 = vsel %vm478_vm13, %v480_v50, %v476_v49 }
 0x78f   :  { %v536_v48 = vmul.f32 %v904_v44, %v534_v30  ;;  %vm541_vm14 = vweird.f32 %v904_v44  ;;  %v484_v5 = vmul.f32 %v481_v53, %v1090_v9 }
 0x790   :  { %vm542_vm0 = vmor %vm540_vm15, %vm541_vm14 }
 0x791   :  { %v537_v51 = vsub.f32 1.0, %v536_v48 }
 0x793   :  { %v538_v55 = vmul.f32 %v904_v44, %v537_v51 }
 0x795   :  { %v539_v56 = vadd.f32 %v904_v44, %v538_v55 }
 0x797   :  { %v543_v59 = vsel %vm542_vm0, %v904_v44, %v539_v56 }
 0x798   :  { %v548_v62 = vsel %vm545_vm2, %v547_v60, %v543_v59  ;;  %vm811_vm2 = vcmask 7168  }
 0x799   :  { %v551_v0 = vmul.f32 %v548_v62, %v1095_v13 }
 0x7d4   :  { %v487_v52 = vpop.permute.xlu2 %486 }
 0x7d5   :  { %v489_v54 = vmul.f32 %v487_v52, %v481_v53 }
 0x7d7   :  { %491 = vrot.lane.b32.xlu1 %v489_v54, %s939_s3 }
 0x7e2   :  { %v554_v61 = vpop.permute.xlu0 %553 }
 0x7e3   :  { %v556_v63 = vmul.f32 %v554_v61, %v548_v62 }
 0x7e5   :  { %558 = vrot.lane.b32.xlu2 %v556_v63, %s939_s3 }
 0x83f   :  { %v559_v1 = vpop.permute.xlu2 %558 }
 0x840   :  { %v1118_v2 = vadd.f32 %v559_v1, %v551_v0 }
 0x842   :  { %905 = vtanh.f32 %v1118_v2 }
 0x848   :  { %v906_v3 = vpop.eup %905 }
 0x849   :  { %564 = vrot.lane.b32.xlu1 %v906_v3, %s939_s3  ;;  %v492_v6 = vpop.permute.xlu1 %491  ;;  %v34_v3 = vld [vmem:[%s1183_s6] sm:$0x1f] }
 0x84a   :  { %v1123_v7 = vadd.f32 %v492_v6, %v484_v5  ;;  %v229_v5 = vperm.slane %v34_v3, 0  ;;  %v637_v6 = vperm.slane %v34_v3, 3 }
 0x84c   :  { %907 = vtanh.f32 %v1123_v7 }
 0x852   :  { %v908_v8 = vpop.eup %907 }
 0x853   :  { %497 = vrot.lane.b32.xlu0 %v908_v8, %s939_s3 }
 0x8bb   :  { %v565_v10 = vpop.permute.xlu1 %564 }
 0x8bc   :  { %v567_v11 = vmul.f32 %v565_v10, %v548_v62 }
 0x8be   :  { %569 = vrot.lane.b32.xlu2 %v567_v11, %s940_s16 }
 0x8c5   :  { %v498_v12 = vpop.permute.xlu0 %497 }
 0x8c6   :  { %v1128_v13 = vmul.f32 %v498_v12, %v481_v53 }
 0x8c8   :  { %573 = vrot.lane.b32.xlu0 %v1128_v13, %s941_s5 }
 0x918   :  { %v570_v9 = vpop.permute.xlu2 %569 }
 0x919   :  { %838 = vmatmul.msk.f32.vlgmr.msra.gmra.mxu2 %vm101_vm6, %v570_v9 }
 0x93a   :  { %v574_v14 = vpop.permute.xlu0 %573 }
 0x93b   :  { %v576_v15 = vsel %vm101_vm6, %v570_v9, %v574_v14  ;;  %v365_v14 = vperm.slane %v34_v3, 1 }
 0x93c   :  { %836 = vmatmul.msk.f32.vlgmr.msrb.gmra.mxu3 %vm168_vm7, %v576_v15 }
 0x99c   :  { %v663_v18 = vpop.f32.mrf.mxu2 }
 0x99d   :  { %v666_v19 = vadd.f32 %v663_v18, %v95_v17 }
 0x99f   :  { %909 = vtanh.f32 %v666_v19  ;;  %v839_v24 = vmul.f32 -1.442695, %v666_v19 }
 0x9a5   :  { %v910_v20 = vpop.eup %909 }
 0x9a6   :  { %689 = vrot.lane.b32.xlu2 %v910_v20, %s938_s2 }
 0x9bf   :  { %v597_v21 = vpop.f32.mrf.mxu3 }
 0x9c0   :  { %v598_v22 = vadd.f32 %v1053_v42, %v597_v21 }
 0x9c2   :  { %911 = vtanh.f32 %v598_v22  ;;  %v837_v41 = vmul.f32 -1.442695, %v598_v22 }
 0x9c3   :  { %913 = vpow2.f32 %v839_v24 }
 0x9c8   :  { %v912_v23 = vpop.eup %911 }
 0x9c9   :  { %622 = vrot.lane.b32.xlu1 %v912_v23, %s938_s2  ;;  %v914_v26 = vpop.eup %913 }
 0x9ca   :  { %v670_v27 = vadd.f32 1.0, %v914_v26 }
 0x9cc   :  { %915 = vrcp.f32 %v670_v27  ;;  %v682_v32 = vand.u32 2147483648, %v670_v27  ;;  %vm676_vm4 = vweird.f32 %v670_v27  ;;  %v680_v34 = vand.u32 2147483647, %v670_v27 }
 0x9cd   :  { %917 = vpow2.f32 %v837_v41 }
 0x9ce   :  { %v683_v36 = vor.u32 1.1754944e-38, %v682_v32  ;;  %vm681_vm8 = vcmp.eq.f32.partialorder %v680_v34, 8.507059e+37 }
 0x9d2   :  { %v916_v28 = vpop.eup %915 }
 0x9d3   :  { %v672_v4 = vmul.f32 %v916_v28, %v670_v27  ;;  %vm677_vm3 = vweird.f32 %v916_v28  ;;  %v918_v30 = vpop.eup %917 }
 0x9d4   :  { %vm678_vm5 = vmor %vm676_vm4, %vm677_vm3  ;;  %v603_v33 = vadd.f32 1.0, %v918_v30 }
 0x9d5   :  { %v673_v37 = vsub.f32 1.0, %v672_v4 }
 0x9d6   :  { %919 = vrcp.f32 %v603_v33  ;;  %v615_v48 = vand.u32 2147483648, %v603_v33  ;;  %vm609_vm10 = vweird.f32 %v603_v33  ;;  %v613_v49 = vand.u32 2147483647, %v603_v33 }
 0x9d7   :  { %v674_v29 = vmul.f32 %v916_v28, %v673_v37 }
 0x9d8   :  { %v616_v51 = vor.u32 1.1754944e-38, %v615_v48  ;;  %vm614_vm11 = vcmp.eq.f32.partialorder %v613_v49, 8.507059e+37 }
 0x9d9   :  { %v675_v31 = vadd.f32 %v916_v28, %v674_v29  ;;  %v501_v29 = vperm.slane %v34_v3, 2 }
 0x9db   :  { %v679_v35 = vsel %vm678_vm5, %v916_v28, %v675_v31  ;;  %v773_v31 = vperm.slane %v34_v3, 4 }
 0x9dc   :  { %v684_v39 = vsel %vm681_vm8, %v683_v36, %v679_v35  ;;  %v920_v43 = vpop.eup %919 }
 0x9dd   :  { %v605_v44 = vmul.f32 %v920_v43, %v603_v33  ;;  %vm610_vm9 = vweird.f32 %v920_v43  ;;  %v687_v55 = vmul.f32 %v684_v39, %v1118_v2 }
 0x9de   :  { %vm611_vm1 = vmor %vm609_vm10, %vm610_vm9 }
 0x9df   :  { %v606_v45 = vsub.f32 1.0, %v605_v44 }
 0x9e1   :  { %v607_v46 = vmul.f32 %v920_v43, %v606_v45 }
 0x9e3   :  { %v608_v47 = vadd.f32 %v920_v43, %v607_v46 }
 0x9e5   :  { %v612_v50 = vsel %vm611_vm1, %v920_v43, %v608_v47 }
 0x9e6   :  { %v617_v53 = vsel %vm614_vm11, %v616_v51, %v612_v50 }
 0x9e7   :  { %v620_v59 = vmul.f32 %v617_v53, %v1123_v7 }
 0xa00   :  { %v690_v38 = vpop.permute.xlu2 %689 }
 0xa01   :  { %v692_v40 = vmul.f32 %v690_v38, %v684_v39 }
 0xa03   :  { %694 = vrot.lane.b32.xlu1 %v692_v40, %s939_s3 }
 0xa3b   :  { %v623_v52 = vpop.permute.xlu1 %622 }
 0xa3c   :  { %v625_v54 = vmul.f32 %v623_v52, %v617_v53 }
 0xa3e   :  { %627 = vrot.lane.b32.xlu0 %v625_v54, %s939_s3 }
 0xa75   :  { %v695_v56 = vpop.permute.xlu1 %694 }
 0xa76   :  { %v697_v57 = vadd.f32 %v695_v56, %v687_v55 }
 0xa78   :  { %921 = vtanh.f32 %v697_v57 }
 0xa7e   :  { %v922_v58 = vpop.eup %921 }
 0xa7f   :  { %700 = vrot.lane.b32.xlu0 %v922_v58, %s939_s3 }
 0xab0   :  { %v628_v60 = vpop.permute.xlu0 %627 }
 0xab1   :  { %v630_v61 = vadd.f32 %v628_v60, %v620_v59 }
 0xab3   :  { %923 = vtanh.f32 %v630_v61 }
 0xab9   :  { %v924_v62 = vpop.eup %923 }
 0xaba   :  { %633 = vrot.lane.b32.xlu2 %v924_v62, %s939_s3 }
 0xaf1   :  { %v701_v63 = vpop.permute.xlu0 %700 }
 0xaf2   :  { %v703_v0 = vmul.f32 %v701_v63, %v684_v39 }
 0xaf4   :  { %705 = vrot.lane.b32.xlu1 %v703_v0, %s940_s16 }
 0xb14   :  { %v634_v1 = vpop.permute.xlu2 %633 }
 0xb15   :  { %v1147_v2 = vmul.f32 %v634_v1, %v617_v53 }
 0xb17   :  { %709 = vrot.lane.b32.xlu2 %v1147_v2, %s941_s5 }
 0xb1f   :  { %231 = vrot.lane.b32.xlu2 %v229_v5, %s942_s27 }
 0xb27   :  { %639 = vrot.lane.b32.xlu2 %v637_v6, %s942_s27 }
 0xb66   :  { %v706_v7 = vpop.permute.xlu1 %705 }
 0xb71   :  { %v710_v8 = vpop.permute.xlu2 %709 }
 0xb72   :  { %v712_v10 = vsel %vm101_vm6, %v706_v7, %v710_v8 }
 0xb73   :  { %840 = vmatmul.msk.f32.vlgmr.msrb.gmra.mxu1 %vm168_vm7, %v712_v10 }
 0xb79   :  { %v232_v38 = vpop.permute.xlu2 %231 }
 0xb7a   :  { %v234_v30 = vmul.f32 %v232_v38, %v1070_v25 }
 0xb81   :  { %v640_v44 = vpop.permute.xlu2 %639 }
 0xb82   :  { %v642_v48 = vmul.f32 %v640_v44, %v1147_v2 }
 0xbf0   :  { %v733_v11 = vpop.f32.mrf.mxu1 }
 0xbf1   :  { %v734_v12 = vadd.f32 %v1053_v42, %v733_v11 }
 0xbf3   :  { %925 = vtanh.f32 %v734_v12  ;;  %v841_v15 = vmul.f32 -1.442695, %v734_v12 }
 0xbf5   :  { %927 = vpow2.f32 %v841_v15 }
 0xbf9   :  { %v926_v9 = vpop.eup %925 }
 0xbfa   :  { %758 = vrot.lane.b32.xlu0 %v926_v9, %s938_s2 }
 0xbfb   :  { %v928_v17 = vpop.eup %927 }
 0xbfc   :  { %v739_v18 = vadd.f32 1.0, %v928_v17 }
 0xbfe   :  { %929 = vrcp.f32 %v739_v18  ;;  %v751_v24 = vand.u32 2147483648, %v739_v18  ;;  %vm745_vm12 = vweird.f32 %v739_v18  ;;  %v749_v42 = vand.u32 2147483647, %v739_v18 }
 0xc00   :  { %v752_v27 = vor.u32 1.1754944e-38, %v751_v24  ;;  %vm750_vm14 = vcmp.eq.f32.partialorder %v749_v42, 8.507059e+37 }
 0xc02   :  { %367 = vrot.lane.b32.xlu0 %v365_v14, %s942_s27 }
 0xc04   :  { %v930_v19 = vpop.eup %929 }
 0xc05   :  { %v741_v20 = vmul.f32 %v930_v19, %v739_v18  ;;  %vm746_vm7 = vweird.f32 %v930_v19 }
 0xc06   :  { %vm747_vm13 = vmor %vm745_vm12, %vm746_vm7 }
 0xc07   :  { %v742_v21 = vsub.f32 1.0, %v741_v20 }
 0xc09   :  { %v743_v22 = vmul.f32 %v930_v19, %v742_v21 }
 0xc0b   :  { %v744_v23 = vadd.f32 %v930_v19, %v743_v22 }
 0xc0d   :  { %v748_v26 = vsel %vm747_vm13, %v930_v19, %v744_v23 }
 0xc0e   :  { %v753_v4 = vsel %vm750_vm14, %v752_v27, %v748_v26 }
 0xc0f   :  { %v756_v32 = vmul.f32 %v753_v4, %v630_v61 }
 0xc6c   :  { %v759_v28 = vpop.permute.xlu0 %758 }
 0xc6d   :  { %v761_v37 = vmul.f32 %v759_v28, %v753_v4 }
 0xc6f   :  { %763 = vrot.lane.b32.xlu1 %v761_v37, %s939_s3 }
 0xc74   :  { %v368_v39 = vpop.permute.xlu0 %367 }
 0xc75   :  { %v370_v41 = vmul.f32 %v368_v39, %v1104_v16  ;;  %v13_v16 = vstv %s1184_s7 }
 0xc76   :  { %14 = vst [vmem:[#allocation2] sm:$0x1] %v13_v16 }
 0xc77   :  { %503 = vrot.lane.b32.xlu1 %v501_v29, %s942_s27  ;;  %v371_v43 = vadd.f32 %v370_v41, %v234_v30 }
 0xc7d   :  { %v852_v53 = vld [vmem:[#allocation2] ss:$0 sm:$0xff] }
 0xc7f   :  { %775 = vrot.lane.b32.xlu1 %v773_v31, %s942_s27 }
 0xce1   :  { %v764_v34 = vpop.permute.xlu1 %763 }
 0xce2   :  { %v766_v35 = vadd.f32 %v764_v34, %v756_v32 }
 0xce4   :  { %931 = vtanh.f32 %v766_v35 }
 0xce9   :  { %v504_v40 = vpop.permute.xlu1 %503 }
 0xcea   :  { %v932_v36 = vpop.eup %931  ;;  %v506_v33 = vmul.f32 %v504_v40, %v1128_v13 }
 0xceb   :  { %769 = vrot.lane.b32.xlu0 %v932_v36, %s939_s3 }
 0xcec   :  { %v507_v45 = vadd.f32 %v506_v33, %v371_v43 }
 0xcee   :  { %v643_v50 = vadd.f32 %v642_v48, %v507_v45 }
 0xcf1   :  { %v776_v47 = vpop.permute.xlu1 %775 }
 0xd5d   :  { %v770_v46 = vpop.permute.xlu0 %769 }
 0xd5e   :  { %v772_v49 = vmul.f32 %v770_v46, %v753_v4 }
 0xd60   :  { %v778_v51 = vmul.f32 %v776_v47, %v772_v49 }
 0xd62   :  { %v779_v52 = vadd.f32 %v778_v51, %v643_v50 }
 0xd64   :  { %781 = vrot.lane.b32.xlu2 %v779_v52, %s940_s16 }
 0xdbe   :  { %v782_v25 = vpop.permute.xlu2 %781 }
 0xdbf   :  { %v784_v13 = vsel %vm101_vm6, %v782_v25, 0.0 }
 0xdc0   :  { %785 = vadd.xlane.f32.xlu0 %v784_v13 }
 0xe33   :  { %v786_v54 = vpop.xlane.xlu0 %785 }
 0xe34   :  { %v791_v55 = vadd.f32 %v852_v53, %v786_v54 }
 0xe36   :  { %v842_v56 = vmul.f32 -1.442695, %v791_v55 }
 0xe38   :  { %933 = vpow2.f32 %v842_v56 }
 0xe3e   :  { %v934_v57 = vpop.eup %933 }
 0xe3f   :  { %v795_v58 = vadd.f32 1.0, %v934_v57 }
 0xe41   :  { %935 = vrcp.f32 %v795_v58  ;;  %v807_v62 = vand.u32 2147483648, %v795_v58  ;;  %v805_v0 = vand.u32 2147483647, %v795_v58  ;;  %vm801_vm0 = vweird.f32 %v795_v58 }
 0xe43   :  { %v808_v2 = vor.u32 1.1754944e-38, %v807_v62  ;;  %vm806_vm3 = vcmp.eq.f32.partialorder %v805_v0, 8.507059e+37 }
 0xe47   :  { %v936_v59 = vpop.eup %935 }
 0xe48   :  { %v797_v60 = vmul.f32 %v936_v59, %v795_v58  ;;  %vm802_vm15 = vweird.f32 %v936_v59 }
 0xe49   :  { %vm803_vm6 = vmor %vm801_vm0, %vm802_vm15 }
 0xe4a   :  { %v798_v61 = vsub.f32 1.0, %v797_v60 }
 0xe4c   :  { %v799_v63 = vmul.f32 %v936_v59, %v798_v61 }
 0xe4e   :  { %v800_v1 = vadd.f32 %v936_v59, %v799_v63 }
 0xe50   :  { %v804_v3 = vsel %vm803_vm6, %v936_v59, %v800_v1 }
 0xe51   :  { %v809_v5 = vsel %vm806_vm3, %v808_v2, %v804_v3 }
 0xe52   :  { %812 = vst.msk [vmem:[%s1185_s8] sm:$0xff] %vm811_vm2, %v809_v5 }

</bundles_post_ra>
